<compile_context>
chip_gen: v7x
topology: tpu7x:2x2x1
jax: 0.10.0
libtpu: 0.0.40
codegen_flags: <defaults>
</compile_context>

<pallas_src>
import functools

import jax
import jax.numpy as jnp
from jax.experimental import pallas as pl
from jax.experimental.pallas import tpu as pltpu

LANE = 128


def _softplus(y):
    # PyTorch nn.Softplus (beta=1, threshold=20):
    #   y              if y > 20
    #   log1p(exp(y))  otherwise  (inner min keeps the untaken exp branch finite)
    return jnp.where(y > 20.0, y, jnp.log1p(jnp.exp(jnp.minimum(y, 20.0))))


def _fused_mlp_kernel(x_ref, w_ref, b_ref, o_ref, *, num_layers, din, lane):
    """One batch tile of the whole MLP; intermediates stay in vregs/VMEM.

    x_ref: (tb, din)   w_ref: (lane, num_layers*lane)   b_ref: (1, num_layers*lane)
    o_ref: (tb, lane)  -- only column 0 is the real output.
    """
    h = x_ref[...].astype(jnp.float32)
    for idx in range(num_layers):
        k = din if idx == 0 else lane                 # contraction depth this layer
        lo = idx * lane
        w = w_ref[:k, lo:lo + lane]                   # static, tile-aligned slice
        b = b_ref[:, lo:lo + lane]                    # (1, lane) broadcasts over rows
        h = jnp.dot(h, w, preferred_element_type=jnp.float32) + b
        if idx != num_layers - 1:
            h = _softplus(h)
    o_ref[...] = h.astype(o_ref.dtype)


def pack_simple_nn_params(params, *, lane=LANE):
    """One-time packing of per-layer (W:(din_i,dout_i), b:(1,dout_i)) into
    a single lane-padded weight slab and bias slab.  Call once, reuse per forward."""
    num_layers = len(params)
    din = params[0][0].shape[0]
    # TODO(synk): layers wider than 128 would need per-layer 128-multiples in the slab.
    assert all(w.shape[0] <= lane and w.shape[1] <= lane for w, _ in params), \
        "packed-slab path assumes every layer dim <= 128"
    w_slab = jnp.zeros((lane, num_layers * lane), jnp.float32)
    b_slab = jnp.zeros((1, num_layers * lane), jnp.float32)
    for idx, (w, b) in enumerate(params):
        r, c = w.shape
        w_slab = w_slab.at[:r, idx * lane: idx * lane + c].set(w)
        b_slab = b_slab.at[:, idx * lane: idx * lane + c].set(b.reshape(1, -1))
    return w_slab, b_slab, din, num_layers


def fused_simple_nn(x, packed, *, batch_tile=512, lane=LANE):
    """x: (B, din); packed: output of pack_simple_nn_params -> (B, 1)."""
    w_slab, b_slab, din, num_layers = packed
    B = x.shape[0]
    tb = min(batch_tile, B)                           # full-B tile when it fits
    grid = (pl.cdiv(B, tb),)

    out_padded = pl.pallas_call(
        functools.partial(_fused_mlp_kernel,
                          num_layers=num_layers, din=din, lane=lane),
        out_shape=jax.ShapeDtypeStruct((B, lane), x.dtype),
        grid=grid,
        in_specs=[
            pl.BlockSpec((tb, din), lambda i: (i, 0)),          # batch-tiled input
            pl.BlockSpec(w_slab.shape, lambda i: (0, 0)),       # resident weight slab
            pl.BlockSpec(b_slab.shape, lambda i: (0, 0)),       # resident bias slab
        ],
        out_specs=pl.BlockSpec((tb, lane), lambda i: (i, 0)),   # lane-dense store
        compiler_params=pltpu.CompilerParams(
            dimension_semantics=("parallel",)),
    )(x, w_slab, b_slab)
    return out_padded[:, :1]


def init_simple_nn_params(key, input_size, hidden_sizes):
    """Deterministic PyTorch-style init: U(-1/sqrt(fan_in), 1/sqrt(fan_in))."""
    sizes = [input_size] + list(hidden_sizes) + [1]
    params = []
    for i in range(len(sizes) - 1):
        fan_in, fan_out = sizes[i], sizes[i + 1]
        key, kw, kb = jax.random.split(key, 3)
        bound = 1.0 / jnp.sqrt(jnp.float32(fan_in))
        w = jax.random.uniform(kw, (fan_in, fan_out), jnp.float32, -bound, bound)
        b = jax.random.uniform(kb, (1, fan_out), jnp.float32, -bound, bound)
        params.append((w, b))
    return params


if __name__ == "__main__":
    key = jax.random.PRNGKey(0)
    batch = 8
    input_size = 32
    hidden_sizes = [32, 32]

    kp, kx = jax.random.split(key)
    params = init_simple_nn_params(kp, input_size, hidden_sizes)
    x = jax.random.normal(kx, (batch, input_size), jnp.float32)

    # One-time packing (hoisted out of the per-call path).
    packed = pack_simple_nn_params(params)
    packed = jax.tree_util.tree_map(
        lambda a: jax.block_until_ready(a) if isinstance(a, jax.Array) else a, packed)

    out = fused_simple_nn(x, packed)
    jax.block_until_ready(out)

    # Pure-JAX reference of the same forward pass (Linear -> Softplus chain).
    ref = x
    for idx, (w, b) in enumerate(params):
        ref = ref @ w + b
        if idx != len(params) - 1:
            ref = jnp.where(ref > 20.0, ref, jnp.log1p(jnp.exp(jnp.minimum(ref, 20.0))))
    assert out.shape == (batch, 1)
    assert jnp.allclose(out, ref, atol=1e-5, rtol=1e-5), (
        f"max abs err {jnp.max(jnp.abs(out - ref))}")

    print("KERNEL_OK")
</pallas_src>

<mosaic_0001>
module attributes {stable_mosaic.version = 11 : i64} {
  func.func @_fused_mlp_kernel(%arg0: i32, %arg1: memref<8x32xf32, #tpu.memory_space<vmem>>, %arg2: memref<128x384xf32, #tpu.memory_space<vmem>>, %arg3: memref<1x384xf32, #tpu.memory_space<vmem>>, %arg4: memref<8x128xf32, #tpu.memory_space<vmem>>) attributes {dimension_semantics = [#tpu.dimension_semantics<parallel>], iteration_bounds = array<i64: 1>, scalar_prefetch = 0 : i64, scratch_operands = 0 : i64, tpu.core_type = #tpu.core_type<tc>, window_params = [{transform_indices = @transform_0, window_bounds = array<i64: 8, 32>}, {pipeline_mode = #tpu.pipeline_mode<synchronous>, transform_indices = @transform_1, window_bounds = array<i64: 128, 384>}, {pipeline_mode = #tpu.pipeline_mode<synchronous>, transform_indices = @transform_2, window_bounds = array<i64: 1, 384>}, {transform_indices = @transform_3, window_bounds = array<i64: 8, 128>}]} {
    %c0 = arith.constant 0 : index
    %c0_0 = arith.constant 0 : index
    %0 = vector.load %arg1[%c0, %c0_0] : memref<8x32xf32, #tpu.memory_space<vmem>>, vector<8x32xf32>
    %c0_1 = arith.constant 0 : index
    %c0_2 = arith.constant 0 : index
    %1 = vector.load %arg2[%c0_1, %c0_2] : memref<128x384xf32, #tpu.memory_space<vmem>>, vector<32x128xf32>
    %c0_3 = arith.constant 0 : index
    %c0_4 = arith.constant 0 : index
    %2 = vector.load %arg3[%c0_3, %c0_4] : memref<1x384xf32, #tpu.memory_space<vmem>>, vector<1x128xf32>
    %cst = arith.constant dense<0.000000e+00> : vector<8x128xf32>
    %3 = tpu.matmul %0, %1, %cst {dimension_numbers = #tpu.dot_dimension_numbers<[1], [0], [0], [1], [0, 0, 1, 1], [], []>} : vector<8x32xf32>, vector<32x128xf32>, vector<8x128xf32> -> vector<8x128xf32>
    %4 = vector.broadcast %2 : vector<1x128xf32> to vector<8x128xf32>
    %5 = arith.addf %3, %4 : vector<8x128xf32>
    %cst_5 = arith.constant 2.000000e+01 : f32
    %6 = vector.broadcast %cst_5 : f32 to vector<8x128xf32>
    %7 = arith.cmpf ogt, %5, %6 : vector<8x128xf32>
    %cst_6 = arith.constant 2.000000e+01 : f32
    %8 = vector.broadcast %cst_6 : f32 to vector<8x128xf32>
    %9 = arith.minimumf %5, %8 : vector<8x128xf32>
    %10 = math.exp %9 : vector<8x128xf32>
    %11 = math.log1p %10 : vector<8x128xf32>
    %12 = arith.select %7, %5, %11 : vector<8x128xi1>, vector<8x128xf32>
    %c0_7 = arith.constant 0 : index
    %c128 = arith.constant 128 : index
    %13 = vector.load %arg2[%c0_7, %c128] : memref<128x384xf32, #tpu.memory_space<vmem>>, vector<128x128xf32>
    %c0_8 = arith.constant 0 : index
    %c128_9 = arith.constant 128 : index
    %14 = vector.load %arg3[%c0_8, %c128_9] : memref<1x384xf32, #tpu.memory_space<vmem>>, vector<1x128xf32>
    %cst_10 = arith.constant dense<0.000000e+00> : vector<8x128xf32>
    %15 = tpu.matmul %12, %13, %cst_10 {dimension_numbers = #tpu.dot_dimension_numbers<[1], [0], [0], [1], [0, 0, 1, 1], [], []>} : vector<8x128xf32>, vector<128x128xf32>, vector<8x128xf32> -> vector<8x128xf32>
    %16 = vector.broadcast %14 : vector<1x128xf32> to vector<8x128xf32>
    %17 = arith.addf %15, %16 : vector<8x128xf32>
    %cst_11 = arith.constant 2.000000e+01 : f32
    %18 = vector.broadcast %cst_11 : f32 to vector<8x128xf32>
    %19 = arith.cmpf ogt, %17, %18 : vector<8x128xf32>
    %cst_12 = arith.constant 2.000000e+01 : f32
    %20 = vector.broadcast %cst_12 : f32 to vector<8x128xf32>
    %21 = arith.minimumf %17, %20 : vector<8x128xf32>
    %22 = math.exp %21 : vector<8x128xf32>
    %23 = math.log1p %22 : vector<8x128xf32>
    %24 = arith.select %19, %17, %23 : vector<8x128xi1>, vector<8x128xf32>
    %c0_13 = arith.constant 0 : index
    %c256 = arith.constant 256 : index
    %25 = vector.load %arg2[%c0_13, %c256] : memref<128x384xf32, #tpu.memory_space<vmem>>, vector<128x128xf32>
    %c0_14 = arith.constant 0 : index
    %c256_15 = arith.constant 256 : index
    %26 = vector.load %arg3[%c0_14, %c256_15] : memref<1x384xf32, #tpu.memory_space<vmem>>, vector<1x128xf32>
    %cst_16 = arith.constant dense<0.000000e+00> : vector<8x128xf32>
    %27 = tpu.matmul %24, %25, %cst_16 {dimension_numbers = #tpu.dot_dimension_numbers<[1], [0], [0], [1], [0, 0, 1, 1], [], []>} : vector<8x128xf32>, vector<128x128xf32>, vector<8x128xf32> -> vector<8x128xf32>
    %28 = vector.broadcast %26 : vector<1x128xf32> to vector<8x128xf32>
    %29 = arith.addf %27, %28 : vector<8x128xf32>
    %c0_17 = arith.constant 0 : index
    %c0_18 = arith.constant 0 : index
    %30 = vector.load %arg4[%c0_17, %c0_18] : memref<8x128xf32, #tpu.memory_space<vmem>>, vector<8x128xf32>
    tpu.vector_store %arg4[%c0_17, %c0_18], %29 {strides = array<i32>} : memref<8x128xf32, #tpu.memory_space<vmem>>, vector<8x128xf32>,
    return
  }
  func.func @transform_0(%arg0: i32) -> (i32, i32) {
    %c0_i32 = arith.constant 0 : i32
    %c0_i32_0 = arith.constant 0 : i32
    return %arg0, %c0_i32 : i32, i32
  }
  func.func @transform_1(%arg0: i32) -> (i32, i32) {
    %c0_i32 = arith.constant 0 : i32
    %c0_i32_0 = arith.constant 0 : i32
    %c0_i32_1 = arith.constant 0 : i32
    return %c0_i32, %c0_i32_0 : i32, i32
  }
  func.func @transform_2(%arg0: i32) -> (i32, i32) {
    %c0_i32 = arith.constant 0 : i32
    %c0_i32_0 = arith.constant 0 : i32
    %c0_i32_1 = arith.constant 0 : i32
    return %c0_i32, %c0_i32_0 : i32, i32
  }
  func.func @transform_3(%arg0: i32) -> (i32, i32) {
    %c0_i32 = arith.constant 0 : i32
    %c0_i32_0 = arith.constant 0 : i32
    return %arg0, %c0_i32 : i32, i32
  }
}

</mosaic_0001>

<bundles_post_ra>
// kernel: tpu_custom_call.1
= control target key start
LH: loop header
LB: loop body
LE: loop exit
PB: predicated region body
PF: predicated region fallthrough
CT: control target
= control target key end

     0   :  { %8 = vsyncpa [#allocation3], 0  ;;  %s725_s0 = inlined_call_operand.hbm [shape: f32[8,32], index: 0, kind: input, shape index: {}]   ;;  %s726_s1 = inlined_call_operand.hbm [shape: f32[128,384], index: 1, kind: input, shape index: {}]   ;;  %s727_s2 = inlined_call_operand.vmem [shape: f32[1,384], index: 2, kind: input, shape index: {}]   ;;  %s728_s3 = inlined_call_operand.hbm [shape: f32[8,128], index: 3, kind: output, shape index: {}]  }
   0x1   :  { %9 = vsyncpa [#allocation6], 0 }
   0x2   :  { %10 = vsyncpa [#allocation4], 0  ;;  %s624_s12 = smov [#allocation2]   ;;  %s625_s14 = smov [#allocation5]  }
   0x3   :  { %s17_s13 = sshll.u32 %s624_s12, 4  ;;  %s26_s15 = sshll.u32 %s625_s14, 4  ;;  %s18_s13 = int_to_ptr.vmem [resolvable:$true] %s17_s13  ;;  %s652_s15 = int_to_ptr.vmem [resolvable:$true] %s26_s15 }
   0x4   :  { %s552_s18 = scalar_lea.hbm %s725_s0, 128 }
   0x5   :  { %p553_p0 = scmp.ne.s32.totalorder %s725_s0, %s552_s18  ;;  %p556_p1 = scmp.lt.u32.totalorder %s552_s18, %s725_s0 }
   0x7   :  { %p558_p2 = pnand %p556_p1, %p553_p0 }
   0x9   :  { %561 = shalt.err (!%p558_p2)
}
   0xa   :  { %s562_s23 = scalar_lea.vmem %s18_s13, 128  ;;  %p567_p4 = scmp.lt.s32.totalorder %s18_s13, %s18_s13 }
   0xb   :  { %p563_p3 = scmp.ne.s32.totalorder %s18_s13, %s562_s23  ;;  %p568_p5 = scmp.lt.s32.totalorder %s562_s23, %s562_s23 }
   0xd   :  { %p569_p6 = por %p568_p5, %p567_p4 }
   0xf   :  { %p570_p7 = pnand %p569_p6, %p563_p3 }
  0x11   :  { %573 = shalt.err (!%p570_p7)
}
  0x12   :  { %20 = dma.hbm_to_vmem [thread:$0]  %s725_s0, 128, %s18_s13, [#allocation3]  }
  0x13   :  { %s574_s28 = scalar_lea.hbm %s726_s1, 6144 }
  0x14   :  { %p575_p8 = scmp.ne.s32.totalorder %s726_s1, %s574_s28  ;;  %p578_p9 = scmp.lt.u32.totalorder %s574_s28, %s726_s1 }
  0x16   :  { %p580_p10 = pnand %p578_p9, %p575_p8 }
  0x18   :  { %583 = shalt.err (!%p580_p10)
}
  0x19   :  { %s584_s6 = scalar_lea.vmem %s652_s15, 6144  ;;  %p589_p12 = scmp.lt.s32.totalorder %s652_s15, %s652_s15 }
  0x1a   :  { %p585_p11 = scmp.ne.s32.totalorder %s652_s15, %s584_s6  ;;  %p590_p13 = scmp.lt.s32.totalorder %s584_s6, %s584_s6 }
  0x1c   :  { %p591_p0 = por %p590_p13, %p589_p12 }
  0x1e   :  { %p592_p1 = pnand %p591_p0, %p585_p11 }
  0x20   :  { %595 = shalt.err (!%p592_p1)
}
  0x21   :  { %s626_s0 = smov 384   ;;  %s627_s7 = smov 24  }
  0x22   :  { %32 = dma.hbm_to_vmem [thread:$0]  %s726_s1, 6144, %s652_s15, [#allocation6], %s626_s0, %s626_s0, %s627_s7  }
  0x23   :  { %618 = dma.done.wait [#allocation3], 128  }
  0x24   :  { %619 = vsyncadd [#allocation3], 4294967168 }
  0x25   :  { %620 = dma.done.wait [#allocation6], 6144  }
  0x26   :  { %621 = vsyncadd [#allocation6], 4294961152  ;;  %v628_v0 = vmov 0.0|0.0   ;;  %vm629_vm0 = vmmov 0   ;;  %v630_v1 = vmov 0.0   ;;  %v42_v2 = vld [vmem:[#allocation5] sm:$0xff] }
  0x27   :  { %482 = vmatprep.subr.bf16.mxu0 %v628_v0  ;;  %409 = vmatprep.mubr.msk.f32.mxu0 %vm629_vm0, %v630_v1  ;;  %v43_v3 = vld [vmem:[#allocation5 + $0x18] sm:$0xff]  ;;  %v44_v4 = vld [vmem:[#allocation5 + $0x30] sm:$0xff]  ;;  %v45_v6 = vld [vmem:[#allocation5 + $0x48] sm:$0xff]  ;;  %vm53_vm1 = vcmask 261120   ;;  %s631_s15 = smov [#allocation7]  }
  0x28   :  { %488 = vmatprep.subr.bf16.mxu1 %v628_v0  ;;  %444 = vmatprep.mubr.msk.f32.mxu1 %vm629_vm0, %v630_v1  ;;  %v483_v5 = vpack.c.bf16 %v43_v3, %v42_v2  ;;  %v486_v7 = vpack.c.bf16 %v45_v6, %v44_v4  ;;  %v41_v8 = vld [vmem:[#allocation2] sm:$0xff]  ;;  %v141_v9 = vld [vmem:[#allocation5 + $0x8] sm:$0xff]  ;;  %v142_v10 = vld [vmem:[#allocation5 + $0x20] sm:$0xff]  ;;  %s348_s16 = sshll.u32 %s631_s15, 4  ;;  %s349_s16 = int_to_ptr.vmem [resolvable:$true] %s348_s16 }
  0x29   :  { %v489_v11 = vpack.c.bf16 %v142_v10, %v141_v9  ;;  %v143_v12 = vld [vmem:[#allocation5 + $0x38] sm:$0xff]  ;;  %v144_v13 = vld [vmem:[#allocation5 + $0x50] sm:$0xff]  ;;  %v145_v15 = vld [vmem:[#allocation5 + $0x68] sm:$0xff]  ;;  %s596_s17 = scalar_lea.vmem %s349_s16, 128  ;;  %p601_p3 = scmp.lt.s32.totalorder %s349_s16, %s349_s16 }
  0x2a   :  { %484 = vmatpush3.bf16.msra.mxu0 %v483_v5  ;;  %v492_v14 = vpack.c.bf16 %v144_v13, %v143_v12  ;;  %v146_v16 = vld [vmem:[#allocation5 + $0x80] sm:$0xff]  ;;  %v147_v18 = vld [vmem:[#allocation5 + $0x98] sm:$0xff]  ;;  %v148_v19 = vld [vmem:[#allocation5 + $0xb0] sm:$0xff]  ;;  %p597_p2 = scmp.ne.s32.totalorder %s349_s16, %s596_s17  ;;  %p602_p4 = scmp.lt.s32.totalorder %s596_s17, %s596_s17 }
  0x2b   :  { %485 = vmatprep.subr.bf16.mxu0 %v628_v0  ;;  %490 = vmatpush3.bf16.msra.mxu1 %v489_v11  ;;  %v495_v17 = vpack.c.bf16 %v146_v16, %v145_v15  ;;  %v498_v20 = vpack.c.bf16 %v148_v19, %v147_v18  ;;  %v149_v21 = vld [vmem:[#allocation5 + $0xc8] sm:$0xff]  ;;  %v150_v22 = vld [vmem:[#allocation5 + $0xe0] sm:$0xff]  ;;  %v151_v24 = vld [vmem:[#allocation5 + $0xf8] sm:$0xff] }
  0x2c   :  { %491 = vmatprep.subr.bf16.mxu1 %v628_v0  ;;  %v501_v23 = vpack.c.bf16 %v150_v22, %v149_v21  ;;  %v152_v25 = vld [vmem:[#allocation5 + $0x110] sm:$0xff]  ;;  %v153_v27 = vld [vmem:[#allocation5 + $0x128] sm:$0xff]  ;;  %v154_v28 = vld [vmem:[#allocation5 + $0x140] sm:$0xff]  ;;  %p603_p5 = por %p602_p4, %p601_p3 }
  0x2d   :  { %v504_v26 = vpack.c.bf16 %v152_v25, %v151_v24  ;;  %v507_v29 = vpack.c.bf16 %v154_v28, %v153_v27  ;;  %v155_v30 = vld [vmem:[#allocation5 + $0x158] sm:$0xff]  ;;  %v156_v31 = vld [vmem:[#allocation5 + $0x170] sm:$0xff]  ;;  %v249_v50 = vld [vmem:[#allocation5 + $0x28] sm:$0xff] }
  0x2e   :  { %487 = vmatpush3.bf16.msra.mxu0 %v486_v7  ;;  %v510_v32 = vpack.c.bf16 %v156_v31, %v155_v30  ;;  %v358_v33 = vld [vmem:[%s727_s2] ss:$0 sm:$0xff]  ;;  %v248_v49 = vld [vmem:[#allocation5 + $0x10] sm:$0xff]  ;;  %v250_v52 = vld [vmem:[#allocation5 + $0x40] sm:$0xff]  ;;  %p604_p6 = pnand %p603_p5, %p597_p2 }
  0x2f   :  { %512 = vmatprep.subr.bf16.mxu0 %v628_v0  ;;  %493 = vmatpush3.bf16.msra.mxu1 %v492_v14  ;;  %v513_v51 = vpack.c.bf16 %v249_v50, %v248_v49  ;;  %v251_v53 = vld [vmem:[#allocation5 + $0x58] sm:$0xff]  ;;  %v252_v55 = vld [vmem:[#allocation5 + $0x70] sm:$0xff]  ;;  %v253_v56 = vld [vmem:[#allocation5 + $0x88] sm:$0xff] }
  0x30   :  { %494 = vmatprep.subr.bf16.mxu1 %v628_v0  ;;  %v516_v54 = vpack.c.bf16 %v251_v53, %v250_v52  ;;  %v519_v57 = vpack.c.bf16 %v253_v56, %v252_v55  ;;  %v254_v58 = vld [vmem:[#allocation5 + $0xa0] sm:$0xff]  ;;  %v255_v59 = vld [vmem:[#allocation5 + $0xb8] sm:$0xff]  ;;  %v256_v61 = vld [vmem:[#allocation5 + $0xd0] sm:$0xff] }
  0x31   :  { %410 = vmatmul.mubr.msk.f32.vlgmr.msra.gmra.mrb[0].mxu0 %vm53_vm1, %v41_v8  ;;  %v522_v60 = vpack.c.bf16 %v255_v59, %v254_v58  ;;  %v257_v62 = vld [vmem:[#allocation5 + $0xe8] sm:$0xff]  ;;  %v259_v2 = vld [vmem:[#allocation5 + $0x118] sm:$0xff]  ;;  %v260_v4 = vld [vmem:[#allocation5 + $0x130] sm:$0xff] }
  0x32   :  { %479 = vmatprep.mubr.msk.f32.mxu0 %vm629_vm0, %v630_v1  ;;  %514 = vmatpush3.bf16.msra.mxu0 %v513_v51  ;;  %v525_v63 = vpack.c.bf16 %v257_v62, %v256_v61  ;;  %v258_v1 = vld [vmem:[#allocation5 + $0x100] sm:$0xff]  ;;  %v261_v5 = vld [vmem:[#allocation5 + $0x148] sm:$0xff]  ;;  %v263_v8 = vld [vmem:[#allocation5 + $0x178] sm:$0xff] }
  0x33   :  { %496 = vmatpush3.bf16.msra.mxu1 %v495_v17  ;;  %515 = vmatprep.subr.bf16.mxu0 %v628_v0  ;;  %v528_v3 = vpack.c.bf16 %v259_v2, %v258_v1  ;;  %v531_v6 = vpack.c.bf16 %v261_v5, %v260_v4  ;;  %v262_v7 = vld [vmem:[#allocation5 + $0x160] sm:$0xff]  ;;  %v360_v10 = vld [vmem:[%s727_s2 + $0x1] ss:$0 sm:$0xff]  ;;  %v361_v25 = vld [vmem:[%s727_s2 + $0x2] ss:$0 sm:$0xff] }
  0x34   :  { %497 = vmatprep.subr.bf16.mxu1 %v628_v0  ;;  %v534_v9 = vpack.c.bf16 %v263_v8, %v262_v7 }
  0x36   :  { %517 = vmatpush3.bf16.msra.mxu0 %v516_v54 }
  0x37   :  { %499 = vmatpush3.bf16.msra.mxu1 %v498_v20  ;;  %518 = vmatprep.subr.bf16.mxu0 %v628_v0 }
  0x38   :  { %500 = vmatprep.subr.bf16.mxu1 %v628_v0 }
  0x3a   :  { %520 = vmatpush3.bf16.msra.mxu0 %v519_v57 }
  0x3b   :  { %502 = vmatpush3.bf16.msra.mxu1 %v501_v23  ;;  %521 = vmatprep.subr.bf16.mxu0 %v628_v0 }
  0x3c   :  { %503 = vmatprep.subr.bf16.mxu1 %v628_v0 }
  0x3e   :  { %523 = vmatpush3.bf16.msra.mxu0 %v522_v60 }
  0x3f   :  { %505 = vmatpush3.bf16.msra.mxu1 %v504_v26  ;;  %524 = vmatprep.subr.bf16.mxu0 %v628_v0 }
  0x40   :  { %506 = vmatprep.subr.bf16.mxu1 %v628_v0 }
  0x42   :  { %526 = vmatpush3.bf16.msra.mxu0 %v525_v63 }
  0x43   :  { %508 = vmatpush3.bf16.msra.mxu1 %v507_v29  ;;  %527 = vmatprep.subr.bf16.mxu0 %v628_v0 }
  0x44   :  { %509 = vmatprep.subr.bf16.mxu1 %v628_v0 }
  0x46   :  { %529 = vmatpush3.bf16.msra.mxu0 %v528_v3 }
  0x47   :  { %511 = vmatpush3.bf16.msra.mxu1 %v510_v32  ;;  %530 = vmatprep.subr.bf16.mxu0 %v628_v0 }
  0x4a   :  { %532 = vmatpush3.bf16.msra.mxu0 %v531_v6 }
  0x4b   :  { %533 = vmatprep.subr.bf16.mxu0 %v628_v0 }
  0x4e   :  { %535 = vmatpush3.bf16.msra.mxu0 %v534_v9 }
 0x104   :  { %v123_v34 = vpop.f32.mrb[0].mxu0 }
 0x105   :  { %v124_v35 = vadd.f32 %v358_v33, %v123_v34  ;;  %v411_v36 = vpop.f32.mrb[1].mxu0 }
 0x107   :  { %v128_v37 = vmin.f32 %v124_v35, 20.0  ;;  %vm127_vm3 = vcmp.gt.f32.partialorder %v124_v35, 20.0 }
 0x109   :  { %v129_v38 = vmul.f32 1.442695, %v128_v37 }
 0x10b   :  { %544 = vpow2.f32 %v129_v38 }
 0x115   :  { %v545_v39 = vpop.eup %544 }
 0x116   :  { %v131_v40 = vadd.f32 1.0, %v545_v39  ;;  %v134_v41 = vmul.f32 -0.5, %v545_v39  ;;  %v137_v43 = vand.u32 2147483647, %v545_v39 }
 0x118   :  { %546 = vlog2.f32 %v131_v40  ;;  %v135_v42 = vadd.f32 1.0, %v134_v41  ;;  %vm138_vm2 = vcmp.lt.f32.partialorder %v137_v43, 0.0004427343 }
 0x11a   :  { %v136_v46 = vmul.f32 %v545_v39, %v135_v42 }
 0x122   :  { %v547_v44 = vpop.eup %546 }
 0x123   :  { %v133_v45 = vmul.f32 0.6931472, %v547_v44 }
 0x125   :  { %v139_v47 = vsel %vm138_vm2, %v136_v46, %v133_v45 }
 0x126   :  { %v140_v48 = vsel %vm127_vm3, %v124_v35, %v139_v47 }
 0x127   :  { %445 = vmatmul.mubr.f32.vlgmr.msra.gmra.mrb[0].mxu1 %v140_v48 }
 0x1fa   :  { %v230_v11 = vpop.f32.mrb[0].mxu1 }
 0x1fb   :  { %v231_v12 = vadd.f32 %v360_v10, %v230_v11  ;;  %v446_v13 = vpop.f32.mrb[1].mxu1 }
 0x1fd   :  { %v235_v14 = vmin.f32 %v231_v12, 20.0  ;;  %vm234_vm5 = vcmp.gt.f32.partialorder %v231_v12, 20.0 }
 0x1ff   :  { %v236_v15 = vmul.f32 1.442695, %v235_v14 }
 0x201   :  { %548 = vpow2.f32 %v236_v15 }
 0x20b   :  { %v549_v16 = vpop.eup %548 }
 0x20c   :  { %v238_v17 = vadd.f32 1.0, %v549_v16  ;;  %v241_v18 = vmul.f32 -0.5, %v549_v16  ;;  %v244_v20 = vand.u32 2147483647, %v549_v16 }
 0x20e   :  { %550 = vlog2.f32 %v238_v17  ;;  %v242_v19 = vadd.f32 1.0, %v241_v18  ;;  %vm245_vm4 = vcmp.lt.f32.partialorder %v244_v20, 0.0004427343 }
 0x210   :  { %v243_v0 = vmul.f32 %v549_v16, %v242_v19 }
 0x218   :  { %v551_v21 = vpop.eup %550 }
 0x219   :  { %v240_v22 = vmul.f32 0.6931472, %v551_v21 }
 0x21b   :  { %v246_v23 = vsel %vm245_vm4, %v243_v0, %v240_v22 }
 0x21c   :  { %v247_v24 = vsel %vm234_vm5, %v231_v12, %v246_v23 }
 0x21d   :  { %480 = vmatmul.mubr.f32.vlgmr.msra.gmra.mrb[2].mxu0 %v247_v24 }
 0x2f0   :  { %v337_v26 = vpop.f32.mrb[2].mxu0 }
 0x2f1   :  { %v338_v27 = vadd.f32 %v361_v25, %v337_v26  ;;  %v481_v28 = vpop.f32.mrb[3].mxu0 }
 0x2f3   :  { %341 = vst [vmem:[#allocation7] sm:$0xff] %v338_v27 }
 0x2f4   :  { %607 = shalt.err (!%p604_p6)
}
 0x2f5   :  { %s608_s20 = scalar_lea.hbm %s728_s3, 128 }
 0x2f6   :  { %p609_p7 = scmp.ne.s32.totalorder %s728_s3, %s608_s20  ;;  %p612_p8 = scmp.lt.u32.totalorder %s608_s20, %s728_s3 }
 0x2f8   :  { %p614_p9 = pnand %p612_p8, %p609_p7 }
 0x2fa   :  { %617 = shalt.err (!%p614_p9)
}
 0x2fb   :  { %351 = dma.vmem_to_hbm [thread:$0]  %s349_s16, 128, %s728_s3, [#allocation4]  }
 0x2fc   :  { %622 = dma.done.wait [#allocation4], 128  }
 0x2fd   :  { %623 = vsyncadd [#allocation4], 4294967168 }
 0x2fe   :  { %355 = vsyncpa [#allocation3], 1 }
 0x2ff   :  { %356 = vsyncpa [#allocation6], 1 }
 0x300   :  { %357 = vsyncpa [#allocation4], 1 }

</bundles_post_ra>
